<compile_context>
chip_gen: v5e
topology: v5e:2x2
jax: 0.10.0
libtpu: 0.0.40
codegen_flags: <defaults>
</compile_context>

<pallas_src>
import jax
import jax.numpy as jnp
from jax.experimental import pallas as pl
from jax.experimental.pallas import tpu as pltpu  # noqa: F401  (kept for parity with TPU-specific tuning hooks)

B, C, L = 2, 6, 6          # C == L == 6 forced by split(…, 2, 1) -> 3 chunks
OUT_ROWS = 2 + 2 + C       # v2 (2) + v3 (2) + [v5,v6,v7] == full transpose (C rows)


def split_cat_kernel(x_ref, o_ref):
    """Single-block kernel.

    x_ref : (B, C, L) VMEM tile (whole input)
    o_ref : (B, OUT_ROWS, L) VMEM tile (whole output)
    """
    # v2 ‖ v3 == contiguous copy of channel rows 2..5 (sublane shift fused
    # into the copy; no full-tile load).
    o_ref[:, 0:4, :] = x_ref[:, 2:6, :]

    # v5 ‖ v6 ‖ v7 == full permute(0, 2, 1) of x.  Done as per-batch trailing
    # 2-D transposes so it lowers to XLU vxpose/rotates without a relayout.
    for b in range(B):          # B is tiny and static -> fully unrolled
        o_ref[b, 4:OUT_ROWS, :] = x_ref[b, :, :].T


def model_forward(x):
    """x: (B, C, L) float32 -> (B, OUT_ROWS, L) float32."""
    b, c, l = x.shape
    assert (c, l) == (C, L)
    bytes_accessed = (b * c * l + b * OUT_ROWS * l) * jnp.dtype(x.dtype).itemsize
    return pl.pallas_call(
        split_cat_kernel,
        out_shape=jax.ShapeDtypeStruct((b, OUT_ROWS, l), x.dtype),
        in_specs=[pl.BlockSpec((b, c, l), lambda: (0, 0, 0))],
        out_specs=pl.BlockSpec((b, OUT_ROWS, l), lambda: (0, 0, 0)),
        cost_estimate=pl.CostEstimate(
            flops=0, transcendentals=0, bytes_accessed=bytes_accessed),
    )(x)


def reference_forward(x):
    """Pure-JAX mirror of the PyTorch forward (minus the invalid v8 cat member)."""
    v2 = x[:, 2:4, :]
    v3 = x[:, 4:6, :]
    v4 = jnp.transpose(x, (0, 2, 1))
    v5 = v4[:, 0:2, :]
    v6 = v4[:, 2:4, :]
    v7 = v4[:, 4:6, :]
    return jnp.concatenate([v2, v3, v5, v6, v7], axis=1)


if __name__ == "__main__":
    key = jax.random.PRNGKey(0)
    kx, kw, kb = jax.random.split(key, 3)

    # Deterministic parameters from __init__ (Conv2d(3, 3, 1, padding=1)).
    # The reference forward never uses self.conv; kept only for parity.
    conv_weight = jax.random.normal(kw, (3, 3, 1, 1), dtype=jnp.float32) * 0.1
    conv_bias = jax.random.normal(kb, (3,), dtype=jnp.float32) * 0.1
    del conv_weight, conv_bias  # unused by the forward pass

    x1 = jax.random.normal(kx, (B, C, L), dtype=jnp.float32)

    out = model_forward(x1)
    out = jax.block_until_ready(out)

    ref = reference_forward(x1)
    assert out.shape == (B, OUT_ROWS, L), out.shape
    assert jnp.allclose(out, ref), "mismatch vs pure-JAX reference"

    print("KERNEL_OK")
</pallas_src>

<mosaic_0001>
module attributes {stable_mosaic.version = 11 : i64} {
  func.func @split_cat_kernel(%arg0: memref<2x6x6xf32, #tpu.memory_space<vmem>>, %arg1: memref<2x10x6xf32, #tpu.memory_space<vmem>>) attributes {dimension_semantics = [], scalar_prefetch = 0 : i64, scratch_operands = 0 : i64, tpu.core_type = #tpu.core_type<tc>} {
    %c0 = arith.constant 0 : index
    %c2 = arith.constant 2 : index
    %c0_0 = arith.constant 0 : index
    %0 = vector.load %arg0[%c0, %c2, %c0_0] : memref<2x6x6xf32, #tpu.memory_space<vmem>>, vector<2x4x6xf32>
    %c0_1 = arith.constant 0 : index
    %c0_2 = arith.constant 0 : index
    %c0_3 = arith.constant 0 : index
    %1 = vector.load %arg1[%c0_1, %c0_2, %c0_3] : memref<2x10x6xf32, #tpu.memory_space<vmem>>, vector<2x4x6xf32>
    tpu.vector_store %arg1[%c0_1, %c0_2, %c0_3], %0 {strides = array<i32>} : memref<2x10x6xf32, #tpu.memory_space<vmem>>, vector<2x4x6xf32>,
    %c0_4 = arith.constant 0 : index
    %c0_5 = arith.constant 0 : index
    %c0_6 = arith.constant 0 : index
    %2 = vector.load %arg0[%c0_4, %c0_5, %c0_6] : memref<2x6x6xf32, #tpu.memory_space<vmem>>, vector<1x6x6xf32>
    %3 = vector.shape_cast %2 : vector<1x6x6xf32> to vector<6x6xf32>
    %4 = tpu.transpose %3, [1, 0] : vector<6x6xf32> -> vector<6x6xf32>
    %c0_7 = arith.constant 0 : index
    %c4 = arith.constant 4 : index
    %c0_8 = arith.constant 0 : index
    %5 = vector.load %arg1[%c0_7, %c4, %c0_8] : memref<2x10x6xf32, #tpu.memory_space<vmem>>, vector<1x6x6xf32>
    %6 = vector.shape_cast %5 : vector<1x6x6xf32> to vector<6x6xf32>
    %7 = vector.shape_cast %4 : vector<6x6xf32> to vector<1x6x6xf32>
    tpu.vector_store %arg1[%c0_7, %c4, %c0_8], %7 {strides = array<i32>} : memref<2x10x6xf32, #tpu.memory_space<vmem>>, vector<1x6x6xf32>,
    %c1 = arith.constant 1 : index
    %c0_9 = arith.constant 0 : index
    %c0_10 = arith.constant 0 : index
    %8 = vector.load %arg0[%c1, %c0_9, %c0_10] : memref<2x6x6xf32, #tpu.memory_space<vmem>>, vector<1x6x6xf32>
    %9 = vector.shape_cast %8 : vector<1x6x6xf32> to vector<6x6xf32>
    %10 = tpu.transpose %9, [1, 0] : vector<6x6xf32> -> vector<6x6xf32>
    %c1_11 = arith.constant 1 : index
    %c4_12 = arith.constant 4 : index
    %c0_13 = arith.constant 0 : index
    %11 = vector.load %arg1[%c1_11, %c4_12, %c0_13] : memref<2x10x6xf32, #tpu.memory_space<vmem>>, vector<1x6x6xf32>
    %12 = vector.shape_cast %11 : vector<1x6x6xf32> to vector<6x6xf32>
    %13 = vector.shape_cast %10 : vector<6x6xf32> to vector<1x6x6xf32>
    tpu.vector_store %arg1[%c1_11, %c4_12, %c0_13], %13 {strides = array<i32>} : memref<2x10x6xf32, #tpu.memory_space<vmem>>, vector<1x6x6xf32>,
    return
  }
}

</mosaic_0001>

<bundles_post_ra>
// kernel: tpu_custom_call.1
= control target key start
LH: loop header
LB: loop body
LE: loop exit
PB: predicated region body
PF: predicated region fallthrough
CT: control target
= control target key end

     0   :  { %vm10_vm0 = vcmask 44032   ;;  %vm46_vm1 = vcmask 46080   ;;  %s125_s0 = inlined_call_operand.vmem [shape: f32[2,6,6], index: 0, kind: input, shape index: {}]   ;;  %s126_s1 = inlined_call_operand.vmem [shape: f32[2,10,6], index: 1, kind: output, shape index: {}]  }
   0x1   :  { %v13_v0 = vld [vmem:[%s125_s0] sm:$0x3f]  ;;  %v9_v2 = vld [vmem:[%s125_s0 + $0xa] sm:$0xf] }
   0x2   :  { %v8_v1 = vld [vmem:[%s125_s0 + $0x2] sm:$0xf]  ;;  %14 = vxpose.xlu0.b32.start.end [1/1] (short) (narrow) %v13_v0, 8  ;;  %12 = vst.msk [vmem:[%s126_s1 + $0x10] sm:$0xf] %vm10_vm0, %v9_v2 }
   0x3   :  { %11 = vst.msk [vmem:[%s126_s1] sm:$0xf] %vm10_vm0, %v8_v1  ;;  %v88_v3 = vld [vmem:[%s125_s0 + $0x8] sm:$0x3f] }
   0xa   :  { %50 = vxpose.xlu0.b32.start.end [1/1] (short) (narrow) %v88_v3, 8 }
  0xa6   :  { %v30_v4 = vpop.trf.xlu0 }
  0xa7   :  { %47 = vst.msk [vmem:[%s126_s1 + $0x4] sm:$0x3f] %vm46_vm1, %v30_v4 }
  0xae   :  { %v66_v5 = vpop.trf.xlu0 }
  0xaf   :  { %89 = vst.msk [vmem:[%s126_s1 + $0x14] sm:$0x3f] %vm46_vm1, %v66_v5 }

</bundles_post_ra>
